<compile_context>
chip_gen: v5e
topology: v5e:2x2
jax: 0.10.0
libtpu: 0.0.40
codegen_flags: <defaults>
</compile_context>

<pallas_src>
import math

import jax
import jax.numpy as jnp
from jax import lax
from jax.experimental import pallas as pl
from jax.experimental.pallas import tpu as pltpu

EPS = 1e-8


def _round_up(x, m):
    return ((x + m - 1) // m) * m


def _pick_t_chunk(S, b_tile, d_pad, *, max_chunk=32,
                  vmem_budget_bytes=24 * 1024 * 1024):
    """Largest divisor of S that keeps the double-buffered chunk under budget."""
    # Per timestep resident in VMEM: 4 gate inputs + 1 output block, f32,
    # double-buffered by the pipeline.
    bytes_per_t = (4 + 1) * b_tile * d_pad * 4 * 2
    cap = max(1, min(max_chunk, vmem_budget_bytes // max(bytes_per_t, 1)))
    for d in range(min(S, cap), 0, -1):
        if S % d == 0:
            return d
    return 1


def _slstm_recurrence_kernel(g_ref, hseq_ref, hF_ref, cF_ref, nF_ref, mF_ref):
    """Pure elementwise sLSTM recurrence over one (batch tile, time chunk).

    g_ref:    (T_CHUNK, 4, B_TILE, D_pad)  biased gate pre-activations (z,i,f,o)
    hseq_ref: (T_CHUNK, B_TILE, D_pad)     per-step hidden outputs
    hF/cF/nF/mF_ref: (B_TILE, D_pad)       resident state (also final-state out)
    """
    t_chunk = g_ref.shape[0]

    # First chunk of the sequence for this batch tile: zero-init the state.
    @pl.when(pl.program_id(1) == 0)
    def _():
        hF_ref[...] = jnp.zeros_like(hF_ref)
        cF_ref[...] = jnp.zeros_like(cF_ref)
        nF_ref[...] = jnp.zeros_like(nF_ref)
        mF_ref[...] = jnp.zeros_like(mF_ref)

    def step(t, carry):
        _, c_p, n_p, m_p = carry
        z_b = g_ref[t, 0]
        i_b = g_ref[t, 1]
        f_b = g_ref[t, 2]
        o_b = g_ref[t, 3]

        z_val = jnp.tanh(z_b)
        o_val = jax.nn.sigmoid(o_b)

        # Direct stabilized exponential gating (no exp-then-log round trip).
        m_new = jnp.maximum(f_b + m_p, i_b)
        i_hat = jnp.exp(i_b - m_new)
        f_hat = jnp.exp(f_b + m_p - m_new)

        c_new = f_hat * c_p + i_hat * z_val
        n_new = f_hat * n_p + i_hat
        h_new = o_val * (c_new * pl.reciprocal(n_new + EPS, approx=True))

        hseq_ref[t] = h_new
        return (h_new, c_new, n_new, m_new)

    carry0 = (hF_ref[...], cF_ref[...], nF_ref[...], mF_ref[...])
    h, c, n, m = lax.fori_loop(0, t_chunk, step, carry0, unroll=True)

    # Write the carried state back once per chunk (resident blocks).
    hF_ref[...] = h
    cF_ref[...] = c
    nF_ref[...] = n
    mF_ref[...] = m


def slstm_cell_forward(x, w_headwise, gate_biases, num_heads, *, max_t_chunk=32):
    """x: (B, S, 4*embedding_dim) float32.

    Returns (h_seq: (B, S, H, hd), state: (h, c, n, m) each (B, H, hd))."""
    B, S, D4 = x.shape
    D = D4 // 4
    hd = D // num_heads
    f32 = jnp.float32

    # --- 1) Hoisted batched gate projection (one MXU-friendly einsum), bias
    #        folded in once.  Compact (4, H, hd, hd) weights — no (4, D, D)
    #        block-diagonal blow-up.  Kept in f32/HIGHEST to match the module.
    x4 = x.astype(f32).reshape(B, S, 4, num_heads, hd)
    pre = jnp.einsum('bsghi,ghoi->bsgho', x4, w_headwise.astype(f32),
                     precision=lax.Precision.HIGHEST)
    pre = pre + gate_biases.astype(f32)[None, None]          # (B, S, 4, H, hd)
    pre = pre.reshape(B, S, 4, D)

    # --- 2) Hardware-friendly layout: time leading (so in-kernel dynamic
    #        indexing is on an untiled dim), batch on sublanes padded to 8,
    #        channels on lanes padded to 128.  Padded entries are zero and
    #        produce finite garbage that is sliced off below.
    B_TILE = 8
    B_pad = _round_up(B, B_TILE)
    D_pad = _round_up(D, 128)
    g = jnp.transpose(pre, (1, 2, 0, 3))                      # (S, 4, B, D)
    g = jnp.pad(g, ((0, 0), (0, 0), (0, B_pad - B), (0, D_pad - D)))

    T_CHUNK = _pick_t_chunk(S, B_TILE, D_pad, max_chunk=max_t_chunk)
    NB = B_pad // B_TILE
    NC = S // T_CHUNK

    state_shape = jax.ShapeDtypeStruct((B_pad, D_pad), f32)
    out_shapes = (jax.ShapeDtypeStruct((S, B_pad, D_pad), f32),
                  state_shape, state_shape, state_shape, state_shape)

    grid_spec = pltpu.PrefetchScalarGridSpec(
        num_scalar_prefetch=0,
        grid=(NB, NC),
        in_specs=[
            pl.BlockSpec((T_CHUNK, 4, B_TILE, D_pad), lambda b, c: (c, 0, b, 0)),
        ],
        out_specs=(
            pl.BlockSpec((T_CHUNK, B_TILE, D_pad), lambda b, c: (c, b, 0)),
            pl.BlockSpec((B_TILE, D_pad), lambda b, c: (b, 0)),
            pl.BlockSpec((B_TILE, D_pad), lambda b, c: (b, 0)),
            pl.BlockSpec((B_TILE, D_pad), lambda b, c: (b, 0)),
            pl.BlockSpec((B_TILE, D_pad), lambda b, c: (b, 0)),
        ),
    )

    hseq, hF, cF, nF, mF = pl.pallas_call(
        _slstm_recurrence_kernel,
        out_shape=out_shapes,
        grid_spec=grid_spec,
        compiler_params=pltpu.CompilerParams(
            dimension_semantics=("parallel", "arbitrary"),
            vmem_limit_bytes=64 * 1024 * 1024),
    )(g)

    h_seq = jnp.transpose(hseq[:, :B, :D], (1, 0, 2)).reshape(B, S, num_heads, hd)
    state = tuple(a[:B, :D].reshape(B, num_heads, hd) for a in (hF, cF, nF, mF))
    return h_seq, state


def slstm_cell_reference(x, w_headwise, gate_biases, num_heads):
    """Pure-JAX mirror of the PyTorch forward (for numerical verification)."""
    B, S, D4 = x.shape
    D = D4 // 4
    hd = D // num_heads
    projs = jnp.split(x, 4, axis=-1)
    transformed = []
    for g in range(4):
        xr = projs[g].reshape(B, S, num_heads, hd)
        tr = jnp.einsum('bshi,hoi->bsho', xr, w_headwise[g],
                        precision=lax.Precision.HIGHEST)
        transformed.append(tr)
    z_t, i_t, f_t, o_t = transformed
    h = jnp.zeros((B, num_heads, hd), jnp.float32)
    c = jnp.zeros_like(h)
    n = jnp.zeros_like(h)
    m = jnp.zeros_like(h)
    outs = []
    for t in range(S):
        zb = z_t[:, t] + gate_biases[0][None]
        ib = i_t[:, t] + gate_biases[1][None]
        fb = f_t[:, t] + gate_biases[2][None]
        ob = o_t[:, t] + gate_biases[3][None]
        z_val = jnp.tanh(zb)
        i_val = jnp.exp(ib)
        f_val = jnp.exp(fb)
        o_val = jax.nn.sigmoid(ob)
        log_f = jnp.log(f_val + EPS)
        log_i = jnp.log(i_val + EPS)
        m_new = jnp.maximum(log_f + m, log_i)
        i_hat = jnp.exp(log_i - m_new)
        f_hat = jnp.exp(log_f + m - m_new)
        c = f_hat * c + i_hat * z_val
        n = f_hat * n + i_hat
        h = o_val * (c / (n + EPS))
        m = m_new
        outs.append(h)
    return jnp.stack(outs, axis=1), (h, c, n, m)


if __name__ == "__main__":
    # Small shapes consistent with the module's forward contract.
    B, S = 2, 8
    embedding_dim, num_heads = 32, 4
    hd = embedding_dim // num_heads

    key = jax.random.PRNGKey(0)
    kx, kw = jax.random.split(key)

    # Deterministic parameter init mirroring sLSTMCell.reset_parameters():
    #  - per-head gate transform weights: small_init (normal, std=sqrt(2/(5*hd_in)))
    std = math.sqrt(2.0 / (5.0 * hd))
    w_headwise = jax.random.normal(kw, (4, num_heads, hd, hd), jnp.float32) * std
    #  - gate biases: z, i, o zeros; f gate power-law, block 0 of 1 (exponent 0.3)
    term = jnp.arange(hd, dtype=jnp.float32) / (hd - 1.0)
    f_bias_row = -(-5.0 + 12.0 * term ** 0.3)
    gate_biases = jnp.zeros((4, num_heads, hd), jnp.float32)
    gate_biases = gate_biases.at[2].set(
        jnp.broadcast_to(f_bias_row[None, :], (num_heads, hd)))

    x = jax.random.normal(kx, (B, S, 4 * embedding_dim), jnp.float32)

    h_seq, state = slstm_cell_forward(x, w_headwise, gate_biases, num_heads)
    jax.block_until_ready(h_seq)
    for s in state:
        jax.block_until_ready(s)

    h_ref, state_ref = slstm_cell_reference(x, w_headwise, gate_biases, num_heads)
    assert h_seq.shape == (B, S, num_heads, hd)
    # Tolerance 2e-3: covers the EUP approximate reciprocal in the output
    # normalization and the (mathematically equivalent) stabilized-gating
    # rewrite vs. the module's log(exp(.)+EPS) formulation.
    assert jnp.allclose(h_seq, h_ref, atol=2e-3, rtol=2e-3), "h_seq mismatch"
    for a, b in zip(state, state_ref):
        assert a.shape == (B, num_heads, hd)
        assert jnp.allclose(a, b, atol=2e-3, rtol=2e-3), "state mismatch"

    print("KERNEL_OK")
</pallas_src>

<mosaic_0001>
module attributes {stable_mosaic.version = 11 : i64} {
  func.func @_slstm_recurrence_kernel(%arg0: i32, %arg1: i32, %arg2: memref<8x4x8x128xf32, #tpu.memory_space<vmem>>, %arg3: memref<8x8x128xf32, #tpu.memory_space<vmem>>, %arg4: memref<8x128xf32, #tpu.memory_space<vmem>>, %arg5: memref<8x128xf32, #tpu.memory_space<vmem>>, %arg6: memref<8x128xf32, #tpu.memory_space<vmem>>, %arg7: memref<8x128xf32, #tpu.memory_space<vmem>>) attributes {dimension_semantics = [#tpu.dimension_semantics<parallel>, #tpu.dimension_semantics<arbitrary>], iteration_bounds = array<i64: 1, 1>, scalar_prefetch = 0 : i64, scratch_operands = 0 : i64, tpu.core_type = #tpu.core_type<tc>, window_params = [{transform_indices = @transform_0, window_bounds = array<i64: 8, 4, 8, 128>}, {transform_indices = @transform_1, window_bounds = array<i64: 8, 8, 128>}, {transform_indices = @transform_2, window_bounds = array<i64: 8, 128>}, {transform_indices = @transform_3, window_bounds = array<i64: 8, 128>}, {transform_indices = @transform_4, window_bounds = array<i64: 8, 128>}, {transform_indices = @transform_5, window_bounds = array<i64: 8, 128>}]} {
    %c0_i32 = arith.constant 0 : i32
    %0 = arith.cmpi eq, %arg1, %c0_i32 : i32
    %1 = arith.extui %0 : i1 to i32
    %c0_i32_0 = arith.constant 0 : i32
    %2 = arith.cmpi ne, %1, %c0_i32_0 : i32
    scf.if %2 {
      %cst_141 = arith.constant 0.000000e+00 : f32
      %323 = vector.broadcast %cst_141 : f32 to vector<8x128xf32>
      %c0_142 = arith.constant 0 : index
      %c0_143 = arith.constant 0 : index
      %324 = vector.load %arg4[%c0_142, %c0_143] : memref<8x128xf32, #tpu.memory_space<vmem>>, vector<8x128xf32>
      tpu.vector_store %arg4[%c0_142, %c0_143], %323 {strides = array<i32>} : memref<8x128xf32, #tpu.memory_space<vmem>>, vector<8x128xf32>,
      %cst_144 = arith.constant 0.000000e+00 : f32
      %325 = vector.broadcast %cst_144 : f32 to vector<8x128xf32>
      %c0_145 = arith.constant 0 : index
      %c0_146 = arith.constant 0 : index
      %326 = vector.load %arg5[%c0_145, %c0_146] : memref<8x128xf32, #tpu.memory_space<vmem>>, vector<8x128xf32>
      tpu.vector_store %arg5[%c0_145, %c0_146], %325 {strides = array<i32>} : memref<8x128xf32, #tpu.memory_space<vmem>>, vector<8x128xf32>,
      %cst_147 = arith.constant 0.000000e+00 : f32
      %327 = vector.broadcast %cst_147 : f32 to vector<8x128xf32>
      %c0_148 = arith.constant 0 : index
      %c0_149 = arith.constant 0 : index
      %328 = vector.load %arg6[%c0_148, %c0_149] : memref<8x128xf32, #tpu.memory_space<vmem>>, vector<8x128xf32>
      tpu.vector_store %arg6[%c0_148, %c0_149], %327 {strides = array<i32>} : memref<8x128xf32, #tpu.memory_space<vmem>>, vector<8x128xf32>,
      %cst_150 = arith.constant 0.000000e+00 : f32
      %329 = vector.broadcast %cst_150 : f32 to vector<8x128xf32>
      %c0_151 = arith.constant 0 : index
      %c0_152 = arith.constant 0 : index
      %330 = vector.load %arg7[%c0_151, %c0_152] : memref<8x128xf32, #tpu.memory_space<vmem>>, vector<8x128xf32>
      tpu.vector_store %arg7[%c0_151, %c0_152], %329 {strides = array<i32>} : memref<8x128xf32, #tpu.memory_space<vmem>>, vector<8x128xf32>,
    } else {
    }
    %c0 = arith.constant 0 : index
    %c0_1 = arith.constant 0 : index
    %3 = vector.load %arg4[%c0, %c0_1] : memref<8x128xf32, #tpu.memory_space<vmem>>, vector<8x128xf32>
    %c0_2 = arith.constant 0 : index
    %c0_3 = arith.constant 0 : index
    %4 = vector.load %arg5[%c0_2, %c0_3] : memref<8x128xf32, #tpu.memory_space<vmem>>, vector<8x128xf32>
    %c0_4 = arith.constant 0 : index
    %c0_5 = arith.constant 0 : index
    %5 = vector.load %arg6[%c0_4, %c0_5] : memref<8x128xf32, #tpu.memory_space<vmem>>, vector<8x128xf32>
    %c0_6 = arith.constant 0 : index
    %c0_7 = arith.constant 0 : index
    %6 = vector.load %arg7[%c0_6, %c0_7] : memref<8x128xf32, #tpu.memory_space<vmem>>, vector<8x128xf32>
    %c0_i32_8 = arith.constant 0 : i32
    %7 = arith.index_cast %c0_i32_8 : i32 to index
    %c0_9 = arith.constant 0 : index
    %c0_10 = arith.constant 0 : index
    %c0_11 = arith.constant 0 : index
    %8 = vector.load %arg2[%7, %c0_9, %c0_10, %c0_11] : memref<8x4x8x128xf32, #tpu.memory_space<vmem>>, vector<1x1x8x128xf32>
    %9 = vector.shape_cast %8 : vector<1x1x8x128xf32> to vector<8x128xf32>
    %10 = arith.index_cast %c0_i32_8 : i32 to index
    %c1 = arith.constant 1 : index
    %c0_12 = arith.constant 0 : index
    %c0_13 = arith.constant 0 : index
    %11 = vector.load %arg2[%10, %c1, %c0_12, %c0_13] : memref<8x4x8x128xf32, #tpu.memory_space<vmem>>, vector<1x1x8x128xf32>
    %12 = vector.shape_cast %11 : vector<1x1x8x128xf32> to vector<8x128xf32>
    %13 = arith.index_cast %c0_i32_8 : i32 to index
    %c2 = arith.constant 2 : index
    %c0_14 = arith.constant 0 : index
    %c0_15 = arith.constant 0 : index
    %14 = vector.load %arg2[%13, %c2, %c0_14, %c0_15] : memref<8x4x8x128xf32, #tpu.memory_space<vmem>>, vector<1x1x8x128xf32>
    %15 = vector.shape_cast %14 : vector<1x1x8x128xf32> to vector<8x128xf32>
    %16 = arith.index_cast %c0_i32_8 : i32 to index
    %c3 = arith.constant 3 : index
    %c0_16 = arith.constant 0 : index
    %c0_17 = arith.constant 0 : index
    %17 = vector.load %arg2[%16, %c3, %c0_16, %c0_17] : memref<8x4x8x128xf32, #tpu.memory_space<vmem>>, vector<1x1x8x128xf32>
    %18 = vector.shape_cast %17 : vector<1x1x8x128xf32> to vector<8x128xf32>
    %19 = math.tanh %9 : vector<8x128xf32>
    %20 = arith.negf %18 : vector<8x128xf32>
    %21 = math.exp %20 : vector<8x128xf32>
    %cst = arith.constant 1.000000e+00 : f32
    %22 = vector.broadcast %cst : f32 to vector<8x128xf32>
    %23 = arith.addf %22, %21 : vector<8x128xf32>
    %24 = arith.divf %22, %23 : vector<8x128xf32>
    %25 = arith.addf %15, %6 : vector<8x128xf32>
    %26 = arith.maximumf %25, %12 : vector<8x128xf32>
    %27 = arith.subf %12, %26 : vector<8x128xf32>
    %28 = math.exp %27 : vector<8x128xf32>
    %29 = arith.addf %15, %6 : vector<8x128xf32>
    %30 = arith.subf %29, %26 : vector<8x128xf32>
    %31 = math.exp %30 : vector<8x128xf32>
    %32 = arith.mulf %31, %4 : vector<8x128xf32>
    %33 = arith.mulf %28, %19 : vector<8x128xf32>
    %34 = arith.addf %32, %33 : vector<8x128xf32>
    %35 = arith.mulf %31, %5 : vector<8x128xf32>
    %36 = arith.addf %35, %28 : vector<8x128xf32>
    %cst_18 = arith.constant 9.99999993E-9 : f32
    %37 = vector.broadcast %cst_18 : f32 to vector<8x128xf32>
    %38 = arith.addf %36, %37 : vector<8x128xf32>
    %39 = tpu.reciprocal %38 {approx = true} : vector<8x128xf32> -> vector<8x128xf32>
    %40 = arith.mulf %34, %39 : vector<8x128xf32>
    %41 = arith.mulf %24, %40 : vector<8x128xf32>
    %42 = arith.index_cast %c0_i32_8 : i32 to index
    %c0_19 = arith.constant 0 : index
    %c0_20 = arith.constant 0 : index
    %43 = vector.load %arg3[%42, %c0_19, %c0_20] : memref<8x8x128xf32, #tpu.memory_space<vmem>>, vector<1x8x128xf32>
    %44 = vector.shape_cast %43 : vector<1x8x128xf32> to vector<8x128xf32>
    %45 = vector.shape_cast %41 : vector<8x128xf32> to vector<1x8x128xf32>
    tpu.vector_store %arg3[%42, %c0_19, %c0_20], %45 {strides = array<i32>} : memref<8x8x128xf32, #tpu.memory_space<vmem>>, vector<1x8x128xf32>,
    %c1_i32 = arith.constant 1 : i32
    %46 = arith.index_cast %c1_i32 : i32 to index
    %c0_21 = arith.constant 0 : index
    %c0_22 = arith.constant 0 : index
    %c0_23 = arith.constant 0 : index
    %47 = vector.load %arg2[%46, %c0_21, %c0_22, %c0_23] : memref<8x4x8x128xf32, #tpu.memory_space<vmem>>, vector<1x1x8x128xf32>
    %48 = vector.shape_cast %47 : vector<1x1x8x128xf32> to vector<8x128xf32>
    %49 = arith.index_cast %c1_i32 : i32 to index
    %c1_24 = arith.constant 1 : index
    %c0_25 = arith.constant 0 : index
    %c0_26 = arith.constant 0 : index
    %50 = vector.load %arg2[%49, %c1_24, %c0_25, %c0_26] : memref<8x4x8x128xf32, #tpu.memory_space<vmem>>, vector<1x1x8x128xf32>
    %51 = vector.shape_cast %50 : vector<1x1x8x128xf32> to vector<8x128xf32>
    %52 = arith.index_cast %c1_i32 : i32 to index
    %c2_27 = arith.constant 2 : index
    %c0_28 = arith.constant 0 : index
    %c0_29 = arith.constant 0 : index
    %53 = vector.load %arg2[%52, %c2_27, %c0_28, %c0_29] : memref<8x4x8x128xf32, #tpu.memory_space<vmem>>, vector<1x1x8x128xf32>
    %54 = vector.shape_cast %53 : vector<1x1x8x128xf32> to vector<8x128xf32>
    %55 = arith.index_cast %c1_i32 : i32 to index
    %c3_30 = arith.constant 3 : index
    %c0_31 = arith.constant 0 : index
    %c0_32 = arith.constant 0 : index
    %56 = vector.load %arg2[%55, %c3_30, %c0_31, %c0_32] : memref<8x4x8x128xf32, #tpu.memory_space<vmem>>, vector<1x1x8x128xf32>
    %57 = vector.shape_cast %56 : vector<1x1x8x128xf32> to vector<8x128xf32>
    %58 = math.tanh %48 : vector<8x128xf32>
    %59 = arith.negf %57 : vector<8x128xf32>
    %60 = math.exp %59 : vector<8x128xf32>
    %cst_33 = arith.constant 1.000000e+00 : f32
    %61 = vector.broadcast %cst_33 : f32 to vector<8x128xf32>
    %62 = arith.addf %61, %60 : vector<8x128xf32>
    %63 = arith.divf %61, %62 : vector<8x128xf32>
    %64 = arith.addf %54, %26 : vector<8x128xf32>
    %65 = arith.maximumf %64, %51 : vector<8x128xf32>
    %66 = arith.subf %51, %65 : vector<8x128xf32>
    %67 = math.exp %66 : vector<8x128xf32>
    %68 = arith.addf %54, %26 : vector<8x128xf32>
    %69 = arith.subf %68, %65 : vector<8x128xf32>
    %70 = math.exp %69 : vector<8x128xf32>
    %71 = arith.mulf %70, %34 : vector<8x128xf32>
    %72 = arith.mulf %67, %58 : vector<8x128xf32>
    %73 = arith.addf %71, %72 : vector<8x128xf32>
    %74 = arith.mulf %70, %36 : vector<8x128xf32>
    %75 = arith.addf %74, %67 : vector<8x128xf32>
    %cst_34 = arith.constant 9.99999993E-9 : f32
    %76 = vector.broadcast %cst_34 : f32 to vector<8x128xf32>
    %77 = arith.addf %75, %76 : vector<8x128xf32>
    %78 = tpu.reciprocal %77 {approx = true} : vector<8x128xf32> -> vector<8x128xf32>
    %79 = arith.mulf %73, %78 : vector<8x128xf32>
    %80 = arith.mulf %63, %79 : vector<8x128xf32>
    %81 = arith.index_cast %c1_i32 : i32 to index
    %c0_35 = arith.constant 0 : index
    %c0_36 = arith.constant 0 : index
    %82 = vector.load %arg3[%81, %c0_35, %c0_36] : memref<8x8x128xf32, #tpu.memory_space<vmem>>, vector<1x8x128xf32>
    %83 = vector.shape_cast %82 : vector<1x8x128xf32> to vector<8x128xf32>
    %84 = vector.shape_cast %80 : vector<8x128xf32> to vector<1x8x128xf32>
    tpu.vector_store %arg3[%81, %c0_35, %c0_36], %84 {strides = array<i32>} : memref<8x8x128xf32, #tpu.memory_space<vmem>>, vector<1x8x128xf32>,
    %c2_i32 = arith.constant 2 : i32
    %85 = arith.index_cast %c2_i32 : i32 to index
    %c0_37 = arith.constant 0 : index
    %c0_38 = arith.constant 0 : index
    %c0_39 = arith.constant 0 : index
    %86 = vector.load %arg2[%85, %c0_37, %c0_38, %c0_39] : memref<8x4x8x128xf32, #tpu.memory_space<vmem>>, vector<1x1x8x128xf32>
    %87 = vector.shape_cast %86 : vector<1x1x8x128xf32> to vector<8x128xf32>
    %88 = arith.index_cast %c2_i32 : i32 to index
    %c1_40 = arith.constant 1 : index
    %c0_41 = arith.constant 0 : index
    %c0_42 = arith.constant 0 : index
    %89 = vector.load %arg2[%88, %c1_40, %c0_41, %c0_42] : memref<8x4x8x128xf32, #tpu.memory_space<vmem>>, vector<1x1x8x128xf32>
    %90 = vector.shape_cast %89 : vector<1x1x8x128xf32> to vector<8x128xf32>
    %91 = arith.index_cast %c2_i32 : i32 to index
    %c2_43 = arith.constant 2 : index
    %c0_44 = arith.constant 0 : index
    %c0_45 = arith.constant 0 : index
    %92 = vector.load %arg2[%91, %c2_43, %c0_44, %c0_45] : memref<8x4x8x128xf32, #tpu.memory_space<vmem>>, vector<1x1x8x128xf32>
    %93 = vector.shape_cast %92 : vector<1x1x8x128xf32> to vector<8x128xf32>
    %94 = arith.index_cast %c2_i32 : i32 to index
    %c3_46 = arith.constant 3 : index
    %c0_47 = arith.constant 0 : index
    %c0_48 = arith.constant 0 : index
    %95 = vector.load %arg2[%94, %c3_46, %c0_47, %c0_48] : memref<8x4x8x128xf32, #tpu.memory_space<vmem>>, vector<1x1x8x128xf32>
    %96 = vector.shape_cast %95 : vector<1x1x8x128xf32> to vector<8x128xf32>
    %97 = math.tanh %87 : vector<8x128xf32>
    %98 = arith.negf %96 : vector<8x128xf32>
    %99 = math.exp %98 : vector<8x128xf32>
    %cst_49 = arith.constant 1.000000e+00 : f32
    %100 = vector.broadcast %cst_49 : f32 to vector<8x128xf32>
    %101 = arith.addf %100, %99 : vector<8x128xf32>
    %102 = arith.divf %100, %101 : vector<8x128xf32>
    %103 = arith.addf %93, %65 : vector<8x128xf32>
    %104 = arith.maximumf %103, %90 : vector<8x128xf32>
    %105 = arith.subf %90, %104 : vector<8x128xf32>
    %106 = math.exp %105 : vector<8x128xf32>
    %107 = arith.addf %93, %65 : vector<8x128xf32>
    %108 = arith.subf %107, %104 : vector<8x128xf32>
    %109 = math.exp %108 : vector<8x128xf32>
    %110 = arith.mulf %109, %73 : vector<8x128xf32>
    %111 = arith.mulf %106, %97 : vector<8x128xf32>
    %112 = arith.addf %110, %111 : vector<8x128xf32>
    %113 = arith.mulf %109, %75 : vector<8x128xf32>
    %114 = arith.addf %113, %106 : vector<8x128xf32>
    %cst_50 = arith.constant 9.99999993E-9 : f32
    %115 = vector.broadcast %cst_50 : f32 to vector<8x128xf32>
    %116 = arith.addf %114, %115 : vector<8x128xf32>
    %117 = tpu.reciprocal %116 {approx = true} : vector<8x128xf32> -> vector<8x128xf32>
    %118 = arith.mulf %112, %117 : vector<8x128xf32>
    %119 = arith.mulf %102, %118 : vector<8x128xf32>
    %120 = arith.index_cast %c2_i32 : i32 to index
    %c0_51 = arith.constant 0 : index
    %c0_52 = arith.constant 0 : index
    %121 = vector.load %arg3[%120, %c0_51, %c0_52] : memref<8x8x128xf32, #tpu.memory_space<vmem>>, vector<1x8x128xf32>
    %122 = vector.shape_cast %121 : vector<1x8x128xf32> to vector<8x128xf32>
    %123 = vector.shape_cast %119 : vector<8x128xf32> to vector<1x8x128xf32>
    tpu.vector_store %arg3[%120, %c0_51, %c0_52], %123 {strides = array<i32>} : memref<8x8x128xf32, #tpu.memory_space<vmem>>, vector<1x8x128xf32>,
    %c3_i32 = arith.constant 3 : i32
    %124 = arith.index_cast %c3_i32 : i32 to index
    %c0_53 = arith.constant 0 : index
    %c0_54 = arith.constant 0 : index
    %c0_55 = arith.constant 0 : index
    %125 = vector.load %arg2[%124, %c0_53, %c0_54, %c0_55] : memref<8x4x8x128xf32, #tpu.memory_space<vmem>>, vector<1x1x8x128xf32>
    %126 = vector.shape_cast %125 : vector<1x1x8x128xf32> to vector<8x128xf32>
    %127 = arith.index_cast %c3_i32 : i32 to index
    %c1_56 = arith.constant 1 : index
    %c0_57 = arith.constant 0 : index
    %c0_58 = arith.constant 0 : index
    %128 = vector.load %arg2[%127, %c1_56, %c0_57, %c0_58] : memref<8x4x8x128xf32, #tpu.memory_space<vmem>>, vector<1x1x8x128xf32>
    %129 = vector.shape_cast %128 : vector<1x1x8x128xf32> to vector<8x128xf32>
    %130 = arith.index_cast %c3_i32 : i32 to index
    %c2_59 = arith.constant 2 : index
    %c0_60 = arith.constant 0 : index
    %c0_61 = arith.constant 0 : index
    %131 = vector.load %arg2[%130, %c2_59, %c0_60, %c0_61] : memref<8x4x8x128xf32, #tpu.memory_space<vmem>>, vector<1x1x8x128xf32>
    %132 = vector.shape_cast %131 : vector<1x1x8x128xf32> to vector<8x128xf32>
    %133 = arith.index_cast %c3_i32 : i32 to index
    %c3_62 = arith.constant 3 : index
    %c0_63 = arith.constant 0 : index
    %c0_64 = arith.constant 0 : index
    %134 = vector.load %arg2[%133, %c3_62, %c0_63, %c0_64] : memref<8x4x8x128xf32, #tpu.memory_space<vmem>>, vector<1x1x8x128xf32>
    %135 = vector.shape_cast %134 : vector<1x1x8x128xf32> to vector<8x128xf32>
    %136 = math.tanh %126 : vector<8x128xf32>
    %137 = arith.negf %135 : vector<8x128xf32>
    %138 = math.exp %137 : vector<8x128xf32>
    %cst_65 = arith.constant 1.000000e+00 : f32
    %139 = vector.broadcast %cst_65 : f32 to vector<8x128xf32>
    %140 = arith.addf %139, %138 : vector<8x128xf32>
    %141 = arith.divf %139, %140 : vector<8x128xf32>
    %142 = arith.addf %132, %104 : vector<8x128xf32>
    %143 = arith.maximumf %142, %129 : vector<8x128xf32>
    %144 = arith.subf %129, %143 : vector<8x128xf32>
    %145 = math.exp %144 : vector<8x128xf32>
    %146 = arith.addf %132, %104 : vector<8x128xf32>
    %147 = arith.subf %146, %143 : vector<8x128xf32>
    %148 = math.exp %147 : vector<8x128xf32>
    %149 = arith.mulf %148, %112 : vector<8x128xf32>
    %150 = arith.mulf %145, %136 : vector<8x128xf32>
    %151 = arith.addf %149, %150 : vector<8x128xf32>
    %152 = arith.mulf %148, %114 : vector<8x128xf32>
    %153 = arith.addf %152, %145 : vector<8x128xf32>
    %cst_66 = arith.constant 9.99999993E-9 : f32
    %154 = vector.broadcast %cst_66 : f32 to vector<8x128xf32>
    %155 = arith.addf %153, %154 : vector<8x128xf32>
    %156 = tpu.reciprocal %155 {approx = true} : vector<8x128xf32> -> vector<8x128xf32>
    %157 = arith.mulf %151, %156 : vector<8x128xf32>
    %158 = arith.mulf %141, %157 : vector<8x128xf32>
    %159 = arith.index_cast %c3_i32 : i32 to index
    %c0_67 = arith.constant 0 : index
    %c0_68 = arith.constant 0 : index
    %160 = vector.load %arg3[%159, %c0_67, %c0_68] : memref<8x8x128xf32, #tpu.memory_space<vmem>>, vector<1x8x128xf32>
    %161 = vector.shape_cast %160 : vector<1x8x128xf32> to vector<8x128xf32>
    %162 = vector.shape_cast %158 : vector<8x128xf32> to vector<1x8x128xf32>
    tpu.vector_store %arg3[%159, %c0_67, %c0_68], %162 {strides = array<i32>} : memref<8x8x128xf32, #tpu.memory_space<vmem>>, vector<1x8x128xf32>,
    %c4_i32 = arith.constant 4 : i32
    %163 = arith.index_cast %c4_i32 : i32 to index
    %c0_69 = arith.constant 0 : index
    %c0_70 = arith.constant 0 : index
    %c0_71 = arith.constant 0 : index
    %164 = vector.load %arg2[%163, %c0_69, %c0_70, %c0_71] : memref<8x4x8x128xf32, #tpu.memory_space<vmem>>, vector<1x1x8x128xf32>
    %165 = vector.shape_cast %164 : vector<1x1x8x128xf32> to vector<8x128xf32>
    %166 = arith.index_cast %c4_i32 : i32 to index
    %c1_72 = arith.constant 1 : index
    %c0_73 = arith.constant 0 : index
    %c0_74 = arith.constant 0 : index
    %167 = vector.load %arg2[%166, %c1_72, %c0_73, %c0_74] : memref<8x4x8x128xf32, #tpu.memory_space<vmem>>, vector<1x1x8x128xf32>
    %168 = vector.shape_cast %167 : vector<1x1x8x128xf32> to vector<8x128xf32>
    %169 = arith.index_cast %c4_i32 : i32 to index
    %c2_75 = arith.constant 2 : index
    %c0_76 = arith.constant 0 : index
    %c0_77 = arith.constant 0 : index
    %170 = vector.load %arg2[%169, %c2_75, %c0_76, %c0_77] : memref<8x4x8x128xf32, #tpu.memory_space<vmem>>, vector<1x1x8x128xf32>
    %171 = vector.shape_cast %170 : vector<1x1x8x128xf32> to vector<8x128xf32>
    %172 = arith.index_cast %c4_i32 : i32 to index
    %c3_78 = arith.constant 3 : index
    %c0_79 = arith.constant 0 : index
    %c0_80 = arith.constant 0 : index
    %173 = vector.load %arg2[%172, %c3_78, %c0_79, %c0_80] : memref<8x4x8x128xf32, #tpu.memory_space<vmem>>, vector<1x1x8x128xf32>
    %174 = vector.shape_cast %173 : vector<1x1x8x128xf32> to vector<8x128xf32>
    %175 = math.tanh %165 : vector<8x128xf32>
    %176 = arith.negf %174 : vector<8x128xf32>
    %177 = math.exp %176 : vector<8x128xf32>
    %cst_81 = arith.constant 1.000000e+00 : f32
    %178 = vector.broadcast %cst_81 : f32 to vector<8x128xf32>
    %179 = arith.addf %178, %177 : vector<8x128xf32>
    %180 = arith.divf %178, %179 : vector<8x128xf32>
    %181 = arith.addf %171, %143 : vector<8x128xf32>
    %182 = arith.maximumf %181, %168 : vector<8x128xf32>
    %183 = arith.subf %168, %182 : vector<8x128xf32>
    %184 = math.exp %183 : vector<8x128xf32>
    %185 = arith.addf %171, %143 : vector<8x128xf32>
    %186 = arith.subf %185, %182 : vector<8x128xf32>
    %187 = math.exp %186 : vector<8x128xf32>
    %188 = arith.mulf %187, %151 : vector<8x128xf32>
    %189 = arith.mulf %184, %175 : vector<8x128xf32>
    %190 = arith.addf %188, %189 : vector<8x128xf32>
    %191 = arith.mulf %187, %153 : vector<8x128xf32>
    %192 = arith.addf %191, %184 : vector<8x128xf32>
    %cst_82 = arith.constant 9.99999993E-9 : f32
    %193 = vector.broadcast %cst_82 : f32 to vector<8x128xf32>
    %194 = arith.addf %192, %193 : vector<8x128xf32>
    %195 = tpu.reciprocal %194 {approx = true} : vector<8x128xf32> -> vector<8x128xf32>
    %196 = arith.mulf %190, %195 : vector<8x128xf32>
    %197 = arith.mulf %180, %196 : vector<8x128xf32>
    %198 = arith.index_cast %c4_i32 : i32 to index
    %c0_83 = arith.constant 0 : index
    %c0_84 = arith.constant 0 : index
    %199 = vector.load %arg3[%198, %c0_83, %c0_84] : memref<8x8x128xf32, #tpu.memory_space<vmem>>, vector<1x8x128xf32>
    %200 = vector.shape_cast %199 : vector<1x8x128xf32> to vector<8x128xf32>
    %201 = vector.shape_cast %197 : vector<8x128xf32> to vector<1x8x128xf32>
    tpu.vector_store %arg3[%198, %c0_83, %c0_84], %201 {strides = array<i32>} : memref<8x8x128xf32, #tpu.memory_space<vmem>>, vector<1x8x128xf32>,
    %c5_i32 = arith.constant 5 : i32
    %202 = arith.index_cast %c5_i32 : i32 to index
    %c0_85 = arith.constant 0 : index
    %c0_86 = arith.constant 0 : index
    %c0_87 = arith.constant 0 : index
    %203 = vector.load %arg2[%202, %c0_85, %c0_86, %c0_87] : memref<8x4x8x128xf32, #tpu.memory_space<vmem>>, vector<1x1x8x128xf32>
    %204 = vector.shape_cast %203 : vector<1x1x8x128xf32> to vector<8x128xf32>
    %205 = arith.index_cast %c5_i32 : i32 to index
    %c1_88 = arith.constant 1 : index
    %c0_89 = arith.constant 0 : index
    %c0_90 = arith.constant 0 : index
    %206 = vector.load %arg2[%205, %c1_88, %c0_89, %c0_90] : memref<8x4x8x128xf32, #tpu.memory_space<vmem>>, vector<1x1x8x128xf32>
    %207 = vector.shape_cast %206 : vector<1x1x8x128xf32> to vector<8x128xf32>
    %208 = arith.index_cast %c5_i32 : i32 to index
    %c2_91 = arith.constant 2 : index
    %c0_92 = arith.constant 0 : index
    %c0_93 = arith.constant 0 : index
    %209 = vector.load %arg2[%208, %c2_91, %c0_92, %c0_93] : memref<8x4x8x128xf32, #tpu.memory_space<vmem>>, vector<1x1x8x128xf32>
    %210 = vector.shape_cast %209 : vector<1x1x8x128xf32> to vector<8x128xf32>
    %211 = arith.index_cast %c5_i32 : i32 to index
    %c3_94 = arith.constant 3 : index
    %c0_95 = arith.constant 0 : index
    %c0_96 = arith.constant 0 : index
    %212 = vector.load %arg2[%211, %c3_94, %c0_95, %c0_96] : memref<8x4x8x128xf32, #tpu.memory_space<vmem>>, vector<1x1x8x128xf32>
    %213 = vector.shape_cast %212 : vector<1x1x8x128xf32> to vector<8x128xf32>
    %214 = math.tanh %204 : vector<8x128xf32>
    %215 = arith.negf %213 : vector<8x128xf32>
    %216 = math.exp %215 : vector<8x128xf32>
    %cst_97 = arith.constant 1.000000e+00 : f32
    %217 = vector.broadcast %cst_97 : f32 to vector<8x128xf32>
    %218 = arith.addf %217, %216 : vector<8x128xf32>
    %219 = arith.divf %217, %218 : vector<8x128xf32>
    %220 = arith.addf %210, %182 : vector<8x128xf32>
    %221 = arith.maximumf %220, %207 : vector<8x128xf32>
    %222 = arith.subf %207, %221 : vector<8x128xf32>
    %223 = math.exp %222 : vector<8x128xf32>
    %224 = arith.addf %210, %182 : vector<8x128xf32>
    %225 = arith.subf %224, %221 : vector<8x128xf32>
    %226 = math.exp %225 : vector<8x128xf32>
    %227 = arith.mulf %226, %190 : vector<8x128xf32>
    %228 = arith.mulf %223, %214 : vector<8x128xf32>
    %229 = arith.addf %227, %228 : vector<8x128xf32>
    %230 = arith.mulf %226, %192 : vector<8x128xf32>
    %231 = arith.addf %230, %223 : vector<8x128xf32>
    %cst_98 = arith.constant 9.99999993E-9 : f32
    %232 = vector.broadcast %cst_98 : f32 to vector<8x128xf32>
    %233 = arith.addf %231, %232 : vector<8x128xf32>
    %234 = tpu.reciprocal %233 {approx = true} : vector<8x128xf32> -> vector<8x128xf32>
    %235 = arith.mulf %229, %234 : vector<8x128xf32>
    %236 = arith.mulf %219, %235 : vector<8x128xf32>
    %237 = arith.index_cast %c5_i32 : i32 to index
    %c0_99 = arith.constant 0 : index
    %c0_100 = arith.constant 0 : index
    %238 = vector.load %arg3[%237, %c0_99, %c0_100] : memref<8x8x128xf32, #tpu.memory_space<vmem>>, vector<1x8x128xf32>
    %239 = vector.shape_cast %238 : vector<1x8x128xf32> to vector<8x128xf32>
    %240 = vector.shape_cast %236 : vector<8x128xf32> to vector<1x8x128xf32>
    tpu.vector_store %arg3[%237, %c0_99, %c0_100], %240 {strides = array<i32>} : memref<8x8x128xf32, #tpu.memory_space<vmem>>, vector<1x8x128xf32>,
    %c6_i32 = arith.constant 6 : i32
    %241 = arith.index_cast %c6_i32 : i32 to index
    %c0_101 = arith.constant 0 : index
    %c0_102 = arith.constant 0 : index
    %c0_103 = arith.constant 0 : index
    %242 = vector.load %arg2[%241, %c0_101, %c0_102, %c0_103] : memref<8x4x8x128xf32, #tpu.memory_space<vmem>>, vector<1x1x8x128xf32>
    %243 = vector.shape_cast %242 : vector<1x1x8x128xf32> to vector<8x128xf32>
    %244 = arith.index_cast %c6_i32 : i32 to index
    %c1_104 = arith.constant 1 : index
    %c0_105 = arith.constant 0 : index
    %c0_106 = arith.constant 0 : index
    %245 = vector.load %arg2[%244, %c1_104, %c0_105, %c0_106] : memref<8x4x8x128xf32, #tpu.memory_space<vmem>>, vector<1x1x8x128xf32>
    %246 = vector.shape_cast %245 : vector<1x1x8x128xf32> to vector<8x128xf32>
    %247 = arith.index_cast %c6_i32 : i32 to index
    %c2_107 = arith.constant 2 : index
    %c0_108 = arith.constant 0 : index
    %c0_109 = arith.constant 0 : index
    %248 = vector.load %arg2[%247, %c2_107, %c0_108, %c0_109] : memref<8x4x8x128xf32, #tpu.memory_space<vmem>>, vector<1x1x8x128xf32>
    %249 = vector.shape_cast %248 : vector<1x1x8x128xf32> to vector<8x128xf32>
    %250 = arith.index_cast %c6_i32 : i32 to index
    %c3_110 = arith.constant 3 : index
    %c0_111 = arith.constant 0 : index
    %c0_112 = arith.constant 0 : index
    %251 = vector.load %arg2[%250, %c3_110, %c0_111, %c0_112] : memref<8x4x8x128xf32, #tpu.memory_space<vmem>>, vector<1x1x8x128xf32>
    %252 = vector.shape_cast %251 : vector<1x1x8x128xf32> to vector<8x128xf32>
    %253 = math.tanh %243 : vector<8x128xf32>
    %254 = arith.negf %252 : vector<8x128xf32>
    %255 = math.exp %254 : vector<8x128xf32>
    %cst_113 = arith.constant 1.000000e+00 : f32
    %256 = vector.broadcast %cst_113 : f32 to vector<8x128xf32>
    %257 = arith.addf %256, %255 : vector<8x128xf32>
    %258 = arith.divf %256, %257 : vector<8x128xf32>
    %259 = arith.addf %249, %221 : vector<8x128xf32>
    %260 = arith.maximumf %259, %246 : vector<8x128xf32>
    %261 = arith.subf %246, %260 : vector<8x128xf32>
    %262 = math.exp %261 : vector<8x128xf32>
    %263 = arith.addf %249, %221 : vector<8x128xf32>
    %264 = arith.subf %263, %260 : vector<8x128xf32>
    %265 = math.exp %264 : vector<8x128xf32>
    %266 = arith.mulf %265, %229 : vector<8x128xf32>
    %267 = arith.mulf %262, %253 : vector<8x128xf32>
    %268 = arith.addf %266, %267 : vector<8x128xf32>
    %269 = arith.mulf %265, %231 : vector<8x128xf32>
    %270 = arith.addf %269, %262 : vector<8x128xf32>
    %cst_114 = arith.constant 9.99999993E-9 : f32
    %271 = vector.broadcast %cst_114 : f32 to vector<8x128xf32>
    %272 = arith.addf %270, %271 : vector<8x128xf32>
    %273 = tpu.reciprocal %272 {approx = true} : vector<8x128xf32> -> vector<8x128xf32>
    %274 = arith.mulf %268, %273 : vector<8x128xf32>
    %275 = arith.mulf %258, %274 : vector<8x128xf32>
    %276 = arith.index_cast %c6_i32 : i32 to index
    %c0_115 = arith.constant 0 : index
    %c0_116 = arith.constant 0 : index
    %277 = vector.load %arg3[%276, %c0_115, %c0_116] : memref<8x8x128xf32, #tpu.memory_space<vmem>>, vector<1x8x128xf32>
    %278 = vector.shape_cast %277 : vector<1x8x128xf32> to vector<8x128xf32>
    %279 = vector.shape_cast %275 : vector<8x128xf32> to vector<1x8x128xf32>
    tpu.vector_store %arg3[%276, %c0_115, %c0_116], %279 {strides = array<i32>} : memref<8x8x128xf32, #tpu.memory_space<vmem>>, vector<1x8x128xf32>,
    %c7_i32 = arith.constant 7 : i32
    %280 = arith.index_cast %c7_i32 : i32 to index
    %c0_117 = arith.constant 0 : index
    %c0_118 = arith.constant 0 : index
    %c0_119 = arith.constant 0 : index
    %281 = vector.load %arg2[%280, %c0_117, %c0_118, %c0_119] : memref<8x4x8x128xf32, #tpu.memory_space<vmem>>, vector<1x1x8x128xf32>
    %282 = vector.shape_cast %281 : vector<1x1x8x128xf32> to vector<8x128xf32>
    %283 = arith.index_cast %c7_i32 : i32 to index
    %c1_120 = arith.constant 1 : index
    %c0_121 = arith.constant 0 : index
    %c0_122 = arith.constant 0 : index
    %284 = vector.load %arg2[%283, %c1_120, %c0_121, %c0_122] : memref<8x4x8x128xf32, #tpu.memory_space<vmem>>, vector<1x1x8x128xf32>
    %285 = vector.shape_cast %284 : vector<1x1x8x128xf32> to vector<8x128xf32>
    %286 = arith.index_cast %c7_i32 : i32 to index
    %c2_123 = arith.constant 2 : index
    %c0_124 = arith.constant 0 : index
    %c0_125 = arith.constant 0 : index
    %287 = vector.load %arg2[%286, %c2_123, %c0_124, %c0_125] : memref<8x4x8x128xf32, #tpu.memory_space<vmem>>, vector<1x1x8x128xf32>
    %288 = vector.shape_cast %287 : vector<1x1x8x128xf32> to vector<8x128xf32>
    %289 = arith.index_cast %c7_i32 : i32 to index
    %c3_126 = arith.constant 3 : index
    %c0_127 = arith.constant 0 : index
    %c0_128 = arith.constant 0 : index
    %290 = vector.load %arg2[%289, %c3_126, %c0_127, %c0_128] : memref<8x4x8x128xf32, #tpu.memory_space<vmem>>, vector<1x1x8x128xf32>
    %291 = vector.shape_cast %290 : vector<1x1x8x128xf32> to vector<8x128xf32>
    %292 = math.tanh %282 : vector<8x128xf32>
    %293 = arith.negf %291 : vector<8x128xf32>
    %294 = math.exp %293 : vector<8x128xf32>
    %cst_129 = arith.constant 1.000000e+00 : f32
    %295 = vector.broadcast %cst_129 : f32 to vector<8x128xf32>
    %296 = arith.addf %295, %294 : vector<8x128xf32>
    %297 = arith.divf %295, %296 : vector<8x128xf32>
    %298 = arith.addf %288, %260 : vector<8x128xf32>
    %299 = arith.maximumf %298, %285 : vector<8x128xf32>
    %300 = arith.subf %285, %299 : vector<8x128xf32>
    %301 = math.exp %300 : vector<8x128xf32>
    %302 = arith.addf %288, %260 : vector<8x128xf32>
    %303 = arith.subf %302, %299 : vector<8x128xf32>
    %304 = math.exp %303 : vector<8x128xf32>
    %305 = arith.mulf %304, %268 : vector<8x128xf32>
    %306 = arith.mulf %301, %292 : vector<8x128xf32>
    %307 = arith.addf %305, %306 : vector<8x128xf32>
    %308 = arith.mulf %304, %270 : vector<8x128xf32>
    %309 = arith.addf %308, %301 : vector<8x128xf32>
    %cst_130 = arith.constant 9.99999993E-9 : f32
    %310 = vector.broadcast %cst_130 : f32 to vector<8x128xf32>
    %311 = arith.addf %309, %310 : vector<8x128xf32>
    %312 = tpu.reciprocal %311 {approx = true} : vector<8x128xf32> -> vector<8x128xf32>
    %313 = arith.mulf %307, %312 : vector<8x128xf32>
    %314 = arith.mulf %297, %313 : vector<8x128xf32>
    %315 = arith.index_cast %c7_i32 : i32 to index
    %c0_131 = arith.constant 0 : index
    %c0_132 = arith.constant 0 : index
    %316 = vector.load %arg3[%315, %c0_131, %c0_132] : memref<8x8x128xf32, #tpu.memory_space<vmem>>, vector<1x8x128xf32>
    %317 = vector.shape_cast %316 : vector<1x8x128xf32> to vector<8x128xf32>
    %318 = vector.shape_cast %314 : vector<8x128xf32> to vector<1x8x128xf32>
    tpu.vector_store %arg3[%315, %c0_131, %c0_132], %318 {strides = array<i32>} : memref<8x8x128xf32, #tpu.memory_space<vmem>>, vector<1x8x128xf32>,
    %c8_i32 = arith.constant 8 : i32
    %c0_133 = arith.constant 0 : index
    %c0_134 = arith.constant 0 : index
    %319 = vector.load %arg4[%c0_133, %c0_134] : memref<8x128xf32, #tpu.memory_space<vmem>>, vector<8x128xf32>
    tpu.vector_store %arg4[%c0_133, %c0_134], %314 {strides = array<i32>} : memref<8x128xf32, #tpu.memory_space<vmem>>, vector<8x128xf32>,
    %c0_135 = arith.constant 0 : index
    %c0_136 = arith.constant 0 : index
    %320 = vector.load %arg5[%c0_135, %c0_136] : memref<8x128xf32, #tpu.memory_space<vmem>>, vector<8x128xf32>
    tpu.vector_store %arg5[%c0_135, %c0_136], %307 {strides = array<i32>} : memref<8x128xf32, #tpu.memory_space<vmem>>, vector<8x128xf32>,
    %c0_137 = arith.constant 0 : index
    %c0_138 = arith.constant 0 : index
    %321 = vector.load %arg6[%c0_137, %c0_138] : memref<8x128xf32, #tpu.memory_space<vmem>>, vector<8x128xf32>
    tpu.vector_store %arg6[%c0_137, %c0_138], %309 {strides = array<i32>} : memref<8x128xf32, #tpu.memory_space<vmem>>, vector<8x128xf32>,
    %c0_139 = arith.constant 0 : index
    %c0_140 = arith.constant 0 : index
    %322 = vector.load %arg7[%c0_139, %c0_140] : memref<8x128xf32, #tpu.memory_space<vmem>>, vector<8x128xf32>
    tpu.vector_store %arg7[%c0_139, %c0_140], %299 {strides = array<i32>} : memref<8x128xf32, #tpu.memory_space<vmem>>, vector<8x128xf32>,
    return
  }
  func.func @transform_0(%arg0: i32, %arg1: i32) -> (i32, i32, i32, i32) {
    %c0_i32 = arith.constant 0 : i32
    %c0_i32_0 = arith.constant 0 : i32
    %c0_i32_1 = arith.constant 0 : i32
    return %arg1, %c0_i32, %arg0, %c0_i32_0 : i32, i32, i32, i32
  }
  func.func @transform_1(%arg0: i32, %arg1: i32) -> (i32, i32, i32) {
    %c0_i32 = arith.constant 0 : i32
    %c0_i32_0 = arith.constant 0 : i32
    return %arg1, %arg0, %c0_i32 : i32, i32, i32
  }
  func.func @transform_2(%arg0: i32, %arg1: i32) -> (i32, i32) {
    %c0_i32 = arith.constant 0 : i32
    %c0_i32_0 = arith.constant 0 : i32
    return %arg0, %c0_i32 : i32, i32
  }
  func.func @transform_3(%arg0: i32, %arg1: i32) -> (i32, i32) {
    %c0_i32 = arith.constant 0 : i32
    %c0_i32_0 = arith.constant 0 : i32
    return %arg0, %c0_i32 : i32, i32
  }
  func.func @transform_4(%arg0: i32, %arg1: i32) -> (i32, i32) {
    %c0_i32 = arith.constant 0 : i32
    %c0_i32_0 = arith.constant 0 : i32
    return %arg0, %c0_i32 : i32, i32
  }
  func.func @transform_5(%arg0: i32, %arg1: i32) -> (i32, i32) {
    %c0_i32 = arith.constant 0 : i32
    %c0_i32_0 = arith.constant 0 : i32
    return %arg0, %c0_i32 : i32, i32
  }
}

</mosaic_0001>

<bundles_post_ra>
// kernel: tpu_custom_call.1
= control target key start
LH: loop header
LB: loop body
LE: loop exit
PB: predicated region body
PF: predicated region fallthrough
CT: control target
= control target key end

     0   :  { %11 = vsyncpa [#allocation3], 0  ;;  %s1072_s0 = inlined_call_operand.hbm [shape: f32[8,4,8,128], index: 0, kind: input, shape index: {}]   ;;  %s1073_s1 = inlined_call_operand.hbm [shape: f32[8,8,128], index: 1, kind: output, shape index: {0}]   ;;  %s1074_s2 = inlined_call_operand.hbm [shape: f32[8,128], index: 2, kind: output, shape index: {1}]   ;;  %s1075_s3 = inlined_call_operand.hbm [shape: f32[8,128], index: 3, kind: output, shape index: {2}]   ;;  %s1076_s4 = inlined_call_operand.hbm [shape: f32[8,128], index: 4, kind: output, shape index: {3}]   ;;  %s1077_s5 = inlined_call_operand.hbm [shape: f32[8,128], index: 5, kind: output, shape index: {4}]  }
   0x1   :  { %12 = vsyncpa [#allocation4], 0 }
   0x2   :  { %13 = vsyncpa [#allocation7], 0 }
   0x3   :  { %14 = vsyncpa [#allocation10], 0  ;;  %s19_s20 = sshll.u32 %s1072_s0, 4  ;;  %s767_s21 = smov [#allocation2]   ;;  %s20_s20 = int_to_ptr.hbm [resolvable:$true] %s19_s20 }
   0x4   :  { %s21_s22 = sshll.u32 %s767_s21, 4  ;;  %s768_s23 = smov 128   ;;  %s22_s22 = int_to_ptr.vmem [resolvable:$true] %s21_s22 }
   0x5   :  { %s769_s24 = smov 8  }
   0x6   :  { %27 = dma.hbm_to_vmem [thread:$0]  %s20_s20, 4096, %s22_s22, [#allocation3], %s768_s23, %s768_s23, %s769_s24  }
   0x7   :  { %759 = dma.done.wait [#allocation3], 4096  }
   0x8   :  { %760 = vsyncadd [#allocation3], 4294963200  ;;  %v45_v0 = vld [vmem:[#allocation2 + $0x8] sm:$0xff]  ;;  %v47_v1 = vld [vmem:[#allocation2 + $0x10] sm:$0xff]  ;;  %s770_s0 = smov [#allocation9]   ;;  %s463_s28 = sshll.u32 %s1076_s4, 4  ;;  %s464_s28 = int_to_ptr.hbm [resolvable:$true] %s463_s28 }
   0x9   :  { %v49_v2 = vld [vmem:[#allocation2 + $0x18] sm:$0xff]  ;;  %v93_v4 = vld [vmem:[#allocation2 + $0x30] sm:$0xff]  ;;  %v71_v5 = vmax.f32 %v47_v1, %v45_v0  ;;  %v43_v6 = vld [vmem:[#allocation2] sm:$0xff]  ;;  %s985_s25 = sshll.u32 %s770_s0, 4  ;;  %s771_s29 = smov [#allocation11]   ;;  %s462_s25 = int_to_ptr.vmem [resolvable:$true] %s985_s25 }
   0xa   :  { %v502_v3 = vmul.f32 -1.442695, %v49_v2  ;;  %v91_v7 = vld [vmem:[#allocation2 + $0x28] sm:$0xff]  ;;  %v140_v11 = vld [vmem:[#allocation2 + $0x50] sm:$0xff]  ;;  %v95_v12 = vld [vmem:[#allocation2 + $0x38] sm:$0xff]  ;;  %s992_s30 = sshll.u32 %s771_s29, 4  ;;  %s473_s30 = int_to_ptr.vmem [resolvable:$true] %s992_s30 }
   0xb   :  { %v72_v8 = vsub.f32 %v45_v0, %v71_v5  ;;  %v75_v9 = vsub.f32 %v47_v1, %v71_v5  ;;  %v116_v10 = vadd.f32 %v93_v4, %v71_v5  ;;  %v142_v16 = vld [vmem:[#allocation2 + $0x58] sm:$0xff]  ;;  %v138_v17 = vld [vmem:[#allocation2 + $0x48] sm:$0xff]  ;;  %v503_v18 = vmul.f32 -1.442695, %v95_v12  ;;  %v187_v26 = vld [vmem:[#allocation2 + $0x70] sm:$0xff]  ;;  %s474_s8 = sshll.u32 %s1077_s5, 4  ;;  %s475_s8 = int_to_ptr.hbm [resolvable:$true] %s474_s8 }
   0xc   :  { %519 = vpow2.f32 %v502_v3  ;;  %v504_v19 = vmul.f32 -1.442695, %v142_v16  ;;  %v89_v27 = vld [vmem:[#allocation2 + $0x20] sm:$0xff]  ;;  %v814_v31 = vld [vmem:[#allocation2 + $0x68] sm:$0xff]  ;;  %v234_v37 = vld [vmem:[#allocation2 + $0x90] sm:$0xff]  ;;  %s772_s4 = smov [#allocation5]  }
   0xd   :  { %521 = vtanh.f32 %v43_v6  ;;  %v73_v13 = vmul.f32 1.442695, %v72_v8  ;;  %v76_v14 = vmul.f32 1.442695, %v75_v9  ;;  %v117_v15 = vmax.f32 %v116_v10, %v91_v7  ;;  %v136_v33 = vld [vmem:[#allocation2 + $0x40] sm:$0xff]  ;;  %v189_v38 = vld [vmem:[#allocation2 + $0x78] sm:$0xff] }
   0xe   :  { %v822_v45 = vld [vmem:[#allocation2 + $0x88] sm:$0xff]  ;;  %v830_v50 = vmul.f32 -1.442695, %v189_v38  ;;  %v281_v55 = vld [vmem:[#allocation2 + $0xb0] sm:$0xff]  ;;  %v183_v5 = vld [vmem:[#allocation2 + $0x60] sm:$0xff]  ;;  %s425_s5 = sshll.u32 %s772_s4, 4  ;;  %s426_s5 = int_to_ptr.vmem [resolvable:$true] %s425_s5 }
   0xf   :  { %523 = vpow2.f32 %v73_v13  ;;  %v163_v20 = vadd.f32 %v140_v11, %v117_v15  ;;  %v118_v21 = vsub.f32 %v91_v7, %v117_v15  ;;  %v121_v22 = vsub.f32 %v116_v10, %v117_v15  ;;  %v842_v63 = vld [vmem:[#allocation2 + $0xa8] sm:$0xff]  ;;  %v328_v7 = vld [vmem:[#allocation2 + $0xd0] sm:$0xff]  ;;  %s427_s11 = sshll.u32 %s1073_s1, 4  ;;  %s773_s12 = smov [#allocation6]   ;;  %s428_s11 = int_to_ptr.hbm [resolvable:$true] %s427_s11 }
  0x10   :  { %525 = vpow2.f32 %v76_v14  ;;  %s439_s13 = sshll.u32 %s773_s12, 4  ;;  %s441_s16 = sshll.u32 %s1074_s2, 4  ;;  %s440_s13 = int_to_ptr.vmem [resolvable:$true] %s439_s13  ;;  %s442_s16 = int_to_ptr.hbm [resolvable:$true] %s441_s16 }
  0x11   :  { %v164_v25 = vmax.f32 %v163_v20, %v138_v17  ;;  %527 = vpow2.f32 %v503_v18  ;;  %v119_v28 = vmul.f32 1.442695, %v118_v21  ;;  %v122_v29 = vmul.f32 1.442695, %v121_v22  ;;  %s774_s17 = smov [#allocation8]   ;;  %s452_s21 = sshll.u32 %s1075_s3, 4  ;;  %s453_s21 = int_to_ptr.hbm [resolvable:$true] %s452_s21 }
  0x12   :  { %v520_v23 = vpop.eup %519  ;;  %529 = vpow2.f32 %v504_v19  ;;  %s450_s18 = sshll.u32 %s774_s17, 4  ;;  %s451_s18 = int_to_ptr.vmem [resolvable:$true] %s450_s18 }
  0x13   :  { %v811_v24 = vadd.f32 1.0, %v520_v23  ;;  %v522_v30 = vpop.eup %521  ;;  %v816_v32 = vadd.f32 %v187_v26, %v164_v25  ;;  %v165_v34 = vsub.f32 %v138_v17, %v164_v25  ;;  %v168_v35 = vsub.f32 %v163_v20, %v164_v25  ;;  %v326_v17 = vld [vmem:[#allocation2 + $0xc8] sm:$0xff]  ;;  %v375_v25 = vld [vmem:[#allocation2 + $0xf0] sm:$0xff] }
  0x15   :  { %531 = vrcp.f32 %v811_v24  ;;  %v524_v36 = vpop.eup %523  ;;  %v820_v41 = vmax.f32 %v816_v32, %v814_v31  ;;  %v169_v42 = vmul.f32 1.442695, %v168_v35  ;;  %v166_v46 = vmul.f32 1.442695, %v165_v34  ;;  %v373_v35 = vld [vmem:[#allocation2 + $0xe8] sm:$0xff] }
  0x16   :  { %533 = vtanh.f32 %v89_v27  ;;  %v526_v39 = vpop.eup %525  ;;  %v79_v40 = vmul.f32 %v524_v36, %v522_v30  ;;  %vm60_vm0 = vweird.f32 %v811_v24  ;;  %v64_v52 = vand.u32 2147483647, %v811_v24 }
  0x17   :  { %535 = vpow2.f32 %v122_v29  ;;  %v528_v43 = vpop.eup %527  ;;  %v78_v44 = vmul.f32 0.0, %v526_v39  ;;  %v826_v48 = vadd.f32 %v234_v37, %v820_v41  ;;  %v66_v61 = vand.u32 2147483648, %v811_v24 }
  0x18   :  { %537 = vpow2.f32 %v119_v28  ;;  %v530_v47 = vpop.eup %529  ;;  %v828_v49 = vadd.f32 1.0, %v528_v43  ;;  %vm851_vm2 = vcmp.eq.f32.partialorder %v64_v52, 8.507059e+37  ;;  %v212_v19 = vsub.f32 %v814_v31, %v820_v41 }
  0x19   :  { %539 = vtanh.f32 %v136_v33  ;;  %v80_v53 = vadd.f32 %v79_v40, %v78_v44  ;;  %v82_v54 = vadd.f32 %v524_v36, %v78_v44  ;;  %v836_v58 = vmax.f32 %v826_v48, %v822_v45 }
  0x1a   :  { %541 = vpow2.f32 %v169_v42  ;;  %v839_v59 = vadd.f32 1.0, %v530_v47  ;;  %v110_v3 = vand.u32 2147483647, %v828_v49  ;;  %v112_v4 = vand.u32 2147483648, %v828_v49 }
  0x1b   :  { %v532_v51 = vpop.eup %531  ;;  %543 = vrcp.f32 %v828_v49  ;;  %v83_v62 = vadd.f32 1e-08, %v82_v54  ;;  %v845_v2 = vadd.f32 %v281_v55, %v836_v58  ;;  %v67_v16 = vor.u32 1.1754944e-38, %v66_v61 }
  0x1c   :  { %v534_v56 = vpop.eup %533  ;;  %v56_v57 = vmul.f32 %v532_v51, %v811_v24  ;;  %vm61_vm1 = vweird.f32 %v532_v51  ;;  %545 = vpow2.f32 %v166_v46  ;;  %vm106_vm4 = vweird.f32 %v828_v49 }
  0x1d   :  { %v536_v60 = vpop.eup %535  ;;  %547 = vrcp.f32 %v83_v62  ;;  %v857_v13 = vmax.f32 %v845_v2, %v842_v63  ;;  %vm863_vm3 = vmor %vm60_vm0, %vm61_vm1  ;;  %vm871_vm5 = vcmp.eq.f32.partialorder %v110_v3, 8.507059e+37  ;;  %v113_v27 = vor.u32 1.1754944e-38, %v112_v4 }
  0x1e   :  { %v538_v0 = vpop.eup %537  ;;  %v57_v1 = vsub.f32 1.0, %v56_v57  ;;  %v124_v8 = vmul.f32 %v536_v60, %v80_v53  ;;  %v127_v10 = vmul.f32 %v536_v60, %v82_v54  ;;  %549 = vrcp.f32 %v839_v59 }
  0x1f   :  { %v849_v6 = vpop.eup %539  ;;  %v125_v9 = vmul.f32 %v538_v0, %v534_v56  ;;  %551 = vtanh.f32 %v183_v5  ;;  %v351_v22 = vadd.f32 %v328_v7, %v857_v13  ;;  %vm153_vm7 = vweird.f32 %v839_v59 }
  0x20   :  { %v58_v11 = vmul.f32 %v532_v51, %v57_v1  ;;  %v542_v14 = vpop.eup %541  ;;  %v128_v18 = vadd.f32 %v538_v0, %v127_v10  ;;  %v159_v52 = vand.u32 2147483648, %v839_v59  ;;  %v306_v55 = vsub.f32 %v842_v63, %v857_v13 }
  0x21   :  { %v544_v20 = vpop.eup %543  ;;  %v126_v28 = vadd.f32 %v125_v9, %v124_v8  ;;  %v352_v31 = vmax.f32 %v351_v22, %v326_v17  ;;  %v213_v9 = vmul.f32 1.442695, %v212_v19  ;;  %v215_v12 = vsub.f32 %v816_v32, %v820_v41 }
  0x22   :  { %v59_v21 = vadd.f32 %v532_v51, %v58_v11  ;;  %v546_v24 = vpop.eup %545  ;;  %v102_v26 = vmul.f32 %v544_v20, %v828_v49  ;;  %v129_v29 = vadd.f32 1e-08, %v128_v18  ;;  %vm107_vm6 = vweird.f32 %v544_v20 }
  0x23   :  { %v548_v33 = vpop.eup %547  ;;  %v174_v37 = vmul.f32 %v542_v14, %v128_v18  ;;  %v353_v40 = vsub.f32 %v326_v17, %v352_v31  ;;  %v356_v42 = vsub.f32 %v351_v22, %v352_v31  ;;  %v883_v43 = vadd.f32 %v375_v25, %v352_v31  ;;  %vm899_vm8 = vmor %vm106_vm4, %vm107_vm6  ;;  %v277_v25 = vld [vmem:[#allocation2 + $0xa0] sm:$0xff] }
  0x24   :  { %v63_v30 = vsel %vm863_vm3, %v532_v51, %v59_v21  ;;  %v103_v36 = vsub.f32 1.0, %v102_v26  ;;  %553 = vrcp.f32 %v129_v29  ;;  %v881_v38 = vpop.eup %549  ;;  %v85_v39 = vmul.f32 %v548_v33, %v80_v53 }
  0x25   :  { %v68_v34 = vsel %vm851_vm2, %v67_v16, %v63_v30  ;;  %v885_v44 = vpop.eup %551  ;;  %v149_v47 = vmul.f32 %v881_v38, %v839_v59  ;;  %v157_v51 = vand.u32 2147483647, %v839_v59  ;;  %v354_v56 = vmul.f32 1.442695, %v353_v40  ;;  %v236_v30 = vld [vmem:[#allocation2 + $0x98] sm:$0xff] }
  0x26   :  { %v104_v46 = vmul.f32 %v544_v20, %v103_v36  ;;  %v86_v54 = vmul.f32 %v85_v39, %v68_v34  ;;  %v894_v53 = vmax.f32 %v883_v43, %v373_v35  ;;  %v903_v62 = vadd.f32 %v546_v24, %v174_v37  ;;  %v330_v39 = vld [vmem:[#allocation2 + $0xd8] sm:$0xff] }
  0x27   :  { %v150_v61 = vsub.f32 1.0, %v149_v47  ;;  %555 = vpow2.f32 %v830_v50  ;;  %v357_v0 = vmul.f32 1.442695, %v356_v42  ;;  %vm154_vm9 = vweird.f32 %v881_v38 }
  0x28   :  { %v105_v60 = vadd.f32 %v544_v20, %v104_v46  ;;  %87 = vst [vmem:[#allocation5] sm:$0xff] %v86_v54  ;;  %v400_v63 = vsub.f32 %v373_v35, %v894_v53  ;;  %v171_v1 = vmul.f32 %v542_v14, %v126_v28  ;;  %557 = vpow2.f32 %v354_v56  ;;  %vm918_vm10 = vmor %vm153_vm7, %vm154_vm9  ;;  %v324_v35 = vld [vmem:[#allocation2 + $0xc0] sm:$0xff] }
  0x29   :  { %420 = vst [vmem:[#allocation11] sm:$0xff] %v894_v53  ;;  %v151_v4 = vmul.f32 %v881_v38, %v150_v61  ;;  %v176_v5 = vadd.f32 1e-08, %v903_v62  ;;  %v259_v14 = vsub.f32 %v822_v45, %v836_v58  ;;  %v172_v16 = vmul.f32 %v546_v24, %v849_v6  ;;  %v230_v45 = vld [vmem:[#allocation2 + $0x80] sm:$0xff] }
  0x2a   :  { %v554_v3 = vpop.eup %553  ;;  %v109_v49 = vsel %vm899_vm8, %v544_v20, %v105_v60  ;;  %v401_v7 = vmul.f32 1.442695, %v400_v63  ;;  %v262_v17 = vsub.f32 %v826_v48, %v836_v58  ;;  %vm929_vm11 = vcmp.eq.f32.partialorder %v157_v51, 8.507059e+37  ;;  %v377_v60 = vld [vmem:[#allocation2 + $0xf8] sm:$0xff] }
  0x2b   :  { %v114_v50 = vsel %vm871_vm5, %v113_v27, %v109_v49  ;;  %v131_v8 = vmul.f32 %v554_v3, %v126_v28  ;;  %v152_v10 = vadd.f32 %v881_v38, %v151_v4  ;;  %559 = vrcp.f32 %v176_v5 }
  0x2c   :  { %561 = vpow2.f32 %v357_v0  ;;  %v160_v19 = vor.u32 1.1754944e-38, %v159_v52  ;;  %v216_v20 = vmul.f32 1.442695, %v215_v12  ;;  %v260_v6 = vmul.f32 1.442695, %v259_v14 }
  0x2d   :  { %v132_v15 = vmul.f32 %v131_v8, %v114_v50  ;;  %v556_v18 = vpop.eup %555  ;;  %563 = vpow2.f32 %v401_v7  ;;  %v156_v32 = vsel %vm918_vm10, %v881_v38, %v152_v10  ;;  %v263_v48 = vmul.f32 1.442695, %v262_v17 }
  0x2e   :  { %v936_v41 = vadd.f32 1.0, %v556_v18  ;;  %565 = vpow2.f32 %v213_v9  ;;  %v938_v21 = vpop.eup %557  ;;  %v309_v58 = vsub.f32 %v845_v2, %v857_v13  ;;  %v173_v22 = vadd.f32 %v172_v16, %v171_v1  ;;  %v283_v13 = vld [vmem:[#allocation2 + $0xb8] sm:$0xff] }
  0x2f   :  { %134 = vst [vmem:[#allocation5 + $0x8] sm:$0xff] %v132_v15  ;;  %567 = vpow2.f32 %v216_v20  ;;  %v161_v24 = vsel %vm929_vm11, %v160_v19, %v156_v32  ;;  %v307_v26 = vmul.f32 1.442695, %v306_v55  ;;  %v403_v2 = vsub.f32 %v883_v43, %v894_v53  ;;  %v371_v53 = vld [vmem:[#allocation2 + $0xe0] sm:$0xff] }
  0x30   :  { %569 = vrcp.f32 %v936_v41  ;;  %v310_v29 = vmul.f32 1.442695, %v309_v58  ;;  %v506_v38 = vmul.f32 -1.442695, %v236_v30  ;;  %v507_v47 = vmul.f32 -1.442695, %v283_v13 }
  0x31   :  { %v560_v23 = vpop.eup %559  ;;  %571 = vtanh.f32 %v230_v45  ;;  %v404_v51 = vmul.f32 1.442695, %v403_v2  ;;  %vm200_vm12 = vweird.f32 %v936_v41  ;;  %v508_v57 = vmul.f32 -1.442695, %v330_v39 }
  0x32   :  { %v945_v27 = vpop.eup %561  ;;  %v178_v28 = vmul.f32 %v560_v23, %v173_v22  ;;  %573 = vpow2.f32 %v260_v6  ;;  %v204_v7 = vand.u32 2147483647, %v936_v41  ;;  %v509_v50 = vmul.f32 -1.442695, %v377_v60 }
  0x33   :  { %v947_v31 = vpop.eup %563  ;;  %575 = vpow2.f32 %v263_v48 }
  0x34   :  { %v566_v33 = vpop.eup %565  ;;  %v179_v34 = vmul.f32 %v178_v28, %v161_v24  ;;  %577 = vtanh.f32 %v277_v25  ;;  %vm205_vm15 = vcmp.eq.f32.partialorder %v204_v7, 8.507059e+37 }
  0x35   :  { %v568_v36 = vpop.eup %567  ;;  %v219_v37 = vmul.f32 %v566_v33, %v885_v44  ;;  %579 = vpow2.f32 %v307_v26  ;;  %v206_v44 = vand.u32 2147483648, %v936_v41 }
  0x36   :  { %v570_v40 = vpop.eup %569  ;;  %181 = vst [vmem:[#allocation5 + $0x10] sm:$0xff] %v179_v34  ;;  %v218_v42 = vmul.f32 %v568_v36, %v173_v22  ;;  %v221_v46 = vmul.f32 %v568_v36, %v903_v62  ;;  %581 = vpow2.f32 %v310_v29 }
  0x37   :  { %v572_v43 = vpop.eup %571  ;;  %v196_v52 = vmul.f32 %v570_v40, %v936_v41  ;;  %583 = vtanh.f32 %v324_v35  ;;  %vm201_vm13 = vweird.f32 %v570_v40  ;;  %v207_v16 = vor.u32 1.1754944e-38, %v206_v44 }
  0x38   :  { %v574_v54 = vpop.eup %573  ;;  %v220_v55 = vadd.f32 %v219_v37, %v218_v42  ;;  %v222_v56 = vadd.f32 %v566_v33, %v221_v46  ;;  %585 = vpow2.f32 %v506_v38  ;;  %vm959_vm14 = vmor %vm200_vm12, %vm201_vm13 }
  0x39   :  { %v576_v61 = vpop.eup %575  ;;  %v197_v0 = vsub.f32 1.0, %v196_v52  ;;  %v266_v62 = vmul.f32 %v574_v54, %v572_v43  ;;  %587 = vpow2.f32 %v507_v47 }
  0x3a   :  { %v578_v63 = vpop.eup %577  ;;  %v223_v1 = vadd.f32 1e-08, %v222_v56  ;;  %v265_v3 = vmul.f32 %v576_v61, %v220_v55  ;;  %v268_v49 = vmul.f32 %v576_v61, %v222_v56  ;;  %589 = vtanh.f32 %v371_v53 }
  0x3b   :  { %v580_v4 = vpop.eup %579  ;;  %v198_v5 = vmul.f32 %v570_v40, %v197_v0 }
  0x3c   :  { %v582_v8 = vpop.eup %581  ;;  %591 = vrcp.f32 %v223_v1  ;;  %v963_v10 = vadd.f32 %v266_v62, %v265_v3  ;;  %v269_v11 = vadd.f32 %v574_v54, %v268_v49  ;;  %v313_v12 = vmul.f32 %v580_v4, %v578_v63 }
  0x3d   :  { %v584_v14 = vpop.eup %583  ;;  %593 = vpow2.f32 %v404_v51  ;;  %v199_v15 = vadd.f32 %v570_v40, %v198_v5 }
  0x3e   :  { %v312_v17 = vmul.f32 %v582_v8, %v963_v10  ;;  %v315_v18 = vmul.f32 %v582_v8, %v269_v11  ;;  %595 = vpow2.f32 %v508_v57  ;;  %v586_v59 = vpop.eup %585  ;;  %v360_v41 = vmul.f32 %v584_v14, %v938_v21 }
  0x3f   :  { %v203_v19 = vsel %vm959_vm14, %v570_v40, %v199_v15  ;;  %597 = vpow2.f32 %v509_v50  ;;  %v588_v20 = vpop.eup %587  ;;  %v971_v6 = vadd.f32 1.0, %v586_v59  ;;  %v270_v58 = vadd.f32 1e-08, %v269_v11 }
  0x40   :  { %v968_v32 = vadd.f32 %v313_v12, %v312_v17  ;;  %v316_v45 = vadd.f32 %v580_v4, %v315_v18  ;;  %v590_v48 = vpop.eup %589  ;;  %v973_v22 = vadd.f32 1.0, %v588_v20  ;;  %v208_v24 = vsel %vm205_vm15, %v207_v16, %v203_v19 }
  0x41   :  { %599 = vrcp.f32 %v971_v6  ;;  %v407_v13 = vmul.f32 %v590_v48, %v947_v31  ;;  %vm247_vm0 = vweird.f32 %v971_v6  ;;  %v251_v51 = vand.u32 2147483647, %v971_v6 }
  0x42   :  { %v592_v23 = vpop.eup %591  ;;  %v359_v25 = vmul.f32 %v945_v27, %v968_v32  ;;  %v362_v26 = vmul.f32 %v945_v27, %v316_v45  ;;  %601 = vrcp.f32 %v973_v22  ;;  %v317_v27 = vadd.f32 1e-08, %v316_v45 }
  0x43   :  { %v594_v28 = vpop.eup %593  ;;  %v225_v29 = vmul.f32 %v592_v23, %v220_v55  ;;  %603 = vrcp.f32 %v270_v58  ;;  %v253_v52 = vand.u32 2147483648, %v971_v6  ;;  %v298_v44 = vand.u32 2147483647, %v973_v22 }
  0x44   :  { %v596_v30 = vpop.eup %595  ;;  %v980_v2 = vadd.f32 %v360_v41, %v359_v25  ;;  %v363_v33 = vadd.f32 %v938_v21, %v362_v26  ;;  %605 = vrcp.f32 %v317_v27  ;;  %v300_v55 = vand.u32 2147483648, %v973_v22 }
  0x45   :  { %v598_v34 = vpop.eup %597  ;;  %v226_v35 = vmul.f32 %v225_v29, %v208_v24  ;;  %v990_v38 = vadd.f32 1.0, %v596_v30  ;;  %vm294_vm2 = vweird.f32 %v973_v22  ;;  %vm1021_vm5 = vcmp.eq.f32.partialorder %v251_v51, 8.507059e+37 }
  0x46   :  { %v406_v36 = vmul.f32 %v594_v28, %v980_v2  ;;  %v409_v37 = vmul.f32 %v594_v28, %v363_v33  ;;  %v364_v40 = vadd.f32 1e-08, %v363_v33  ;;  %v1002_v43 = vadd.f32 1.0, %v598_v34 }
  0x47   :  { %228 = vst [vmem:[#allocation5 + $0x18] sm:$0xff] %v226_v35  ;;  %v600_v21 = vpop.eup %599  ;;  %607 = vrcp.f32 %v990_v38  ;;  %v254_v63 = vor.u32 1.1754944e-38, %v253_v52  ;;  %vm1033_vm7 = vcmp.eq.f32.partialorder %v298_v44, 8.507059e+37  ;;  %v301_v50 = vor.u32 1.1754944e-38, %v300_v55 }
  0x48   :  { %v997_v39 = vadd.f32 %v407_v13, %v406_v36  ;;  %v602_v42 = vpop.eup %601  ;;  %v410_v46 = vadd.f32 %v947_v31, %v409_v37  ;;  %v243_v47 = vmul.f32 %v600_v21, %v971_v6  ;;  %vm248_vm1 = vweird.f32 %v600_v21 }
  0x49   :  { %v290_v54 = vmul.f32 %v602_v42, %v973_v22  ;;  %v604_v56 = vpop.eup %603  ;;  %vm295_vm3 = vweird.f32 %v602_v42  ;;  %609 = vrcp.f32 %v364_v40  ;;  %vm1017_vm4 = vmor %vm247_vm0, %vm248_vm1  ;;  %vm341_vm8 = vweird.f32 %v990_v38 }
  0x4a   :  { %418 = vst [vmem:[#allocation8] sm:$0xff] %v997_v39  ;;  %v244_v31 = vsub.f32 1.0, %v243_v47  ;;  %v411_v57 = vadd.f32 1e-08, %v410_v46  ;;  %611 = vrcp.f32 %v1002_v43  ;;  %v606_v61 = vpop.eup %605  ;;  %v272_v4 = vmul.f32 %v604_v56, %v963_v10  ;;  %vm1029_vm6 = vmor %vm294_vm2, %vm295_vm3 }
  0x4b   :  { %419 = vst [vmem:[#allocation9] sm:$0xff] %v410_v46  ;;  %v291_v53 = vsub.f32 1.0, %v290_v54  ;;  %v319_v9 = vmul.f32 %v606_v61, %v968_v32  ;;  %v345_v12 = vand.u32 2147483647, %v990_v38  ;;  %v347_v14 = vand.u32 2147483648, %v990_v38 }
  0x4c   :  { %466 = dma.vmem_to_hbm [thread:$0]  %s462_s25, 128, %s464_s28, [#allocation10]   ;;  %v245_v60 = vmul.f32 %v600_v21, %v244_v31  ;;  %613 = vrcp.f32 %v411_v57  ;;  %vm388_vm10 = vweird.f32 %v1002_v43  ;;  %v392_v48 = vand.u32 2147483647, %v1002_v43 }
  0x4d   :  { %477 = dma.vmem_to_hbm [thread:$0]  %s473_s30, 128, %s475_s8, [#allocation10]   ;;  %v292_v1 = vmul.f32 %v602_v42, %v291_v53  ;;  %v608_v3 = vpop.eup %607  ;;  %vm346_vm12 = vcmp.eq.f32.partialorder %v345_v12, 8.507059e+37  ;;  %v348_v6 = vor.u32 1.1754944e-38, %v347_v14  ;;  %v394_v58 = vand.u32 2147483648, %v1002_v43 }
  0x4e   :  { %v246_v49 = vadd.f32 %v600_v21, %v245_v60  ;;  %v337_v11 = vmul.f32 %v608_v3, %v990_v38  ;;  %vm342_vm9 = vweird.f32 %v608_v3  ;;  %vm393_vm15 = vcmp.eq.f32.partialorder %v392_v48, 8.507059e+37 }
  0x4f   :  { %v293_v8 = vadd.f32 %v602_v42, %v292_v1  ;;  %v610_v15 = vpop.eup %609  ;;  %vm343_vm11 = vmor %vm341_vm8, %vm342_vm9  ;;  %v395_v30 = vor.u32 1.1754944e-38, %v394_v58 }
  0x50   :  { %v250_v10 = vsel %vm1017_vm4, %v600_v21, %v246_v49  ;;  %v338_v18 = vsub.f32 1.0, %v337_v11  ;;  %v612_v59 = vpop.eup %611  ;;  %v366_v23 = vmul.f32 %v610_v15, %v980_v2 }
  0x51   :  { %v255_v16 = vsel %vm1021_vm5, %v254_v63, %v250_v10  ;;  %v297_v17 = vsel %vm1029_vm6, %v602_v42, %v293_v8  ;;  %v384_v45 = vmul.f32 %v612_v59, %v1002_v43  ;;  %vm389_vm13 = vweird.f32 %v612_v59 }
  0x52   :  { %v273_v19 = vmul.f32 %v272_v4, %v255_v16  ;;  %v302_v20 = vsel %vm1033_vm7, %v301_v50, %v297_v17  ;;  %v339_v41 = vmul.f32 %v608_v3, %v338_v18  ;;  %v614_v25 = vpop.eup %613  ;;  %vm390_vm14 = vmor %vm388_vm10, %vm389_vm13 }
  0x53   :  { %v320_v32 = vmul.f32 %v319_v9, %v302_v20  ;;  %v385_v24 = vsub.f32 1.0, %v384_v45  ;;  %v413_v34 = vmul.f32 %v614_v25, %v997_v39 }
  0x54   :  { %275 = vst [vmem:[#allocation5 + $0x20] sm:$0xff] %v273_v19  ;;  %v340_v22 = vadd.f32 %v608_v3, %v339_v41 }
  0x55   :  { %322 = vst [vmem:[#allocation5 + $0x28] sm:$0xff] %v320_v32  ;;  %v386_v28 = vmul.f32 %v612_v59, %v385_v24 }
  0x56   :  { %v344_v26 = vsel %vm343_vm11, %v608_v3, %v340_v22 }
  0x57   :  { %v349_v29 = vsel %vm346_vm12, %v348_v6, %v344_v26  ;;  %v387_v33 = vadd.f32 %v612_v59, %v386_v28 }
  0x58   :  { %v367_v13 = vmul.f32 %v366_v23, %v349_v29 }
  0x59   :  { %v391_v2 = vsel %vm390_vm14, %v612_v59, %v387_v33 }
  0x5a   :  { %369 = vst [vmem:[#allocation5 + $0x30] sm:$0xff] %v367_v13  ;;  %v396_v35 = vsel %vm393_vm15, %v395_v30, %v391_v2 }
  0x5b   :  { %v414_v36 = vmul.f32 %v413_v34, %v396_v35 }
  0x5d   :  { %416 = vst [vmem:[#allocation5 + $0x38] sm:$0xff] %v414_v36 }
  0x5e   :  { %417 = vst [vmem:[#allocation6] sm:$0xff] %v414_v36  ;;  %433 = dma.vmem_to_hbm [thread:$0]  %s426_s5, 1024, %s428_s11, [#allocation4], %s768_s23, %s768_s23, %s769_s24  }
  0x5f   :  { %444 = dma.vmem_to_hbm [thread:$0]  %s440_s13, 128, %s442_s16, [#allocation7]  }
  0x60   :  { %455 = dma.vmem_to_hbm [thread:$0]  %s451_s18, 128, %s453_s21, [#allocation7]  }
  0x61   :  { %761 = dma.done.wait [#allocation4], 1024  }
  0x62   :  { %762 = vsyncadd [#allocation4], 4294966272 }
  0x63   :  { %763 = dma.done.wait [#allocation7], 256  }
  0x64   :  { %764 = vsyncadd [#allocation7], 4294967040 }
  0x65   :  { %765 = dma.done.wait [#allocation10], 256  }
  0x66   :  { %766 = vsyncadd [#allocation10], 4294967040 }
  0x67   :  { %498 = vsyncpa [#allocation3], 1 }
  0x68   :  { %499 = vsyncpa [#allocation4], 1 }
  0x69   :  { %500 = vsyncpa [#allocation7], 1 }
  0x6a   :  { %501 = vsyncpa [#allocation10], 1 }

</bundles_post_ra>
